<compile_context>
chip_gen: v6e
topology: v6e:2x2x1
jax: 0.10.0
libtpu: 0.0.40
codegen_flags: <defaults>
</compile_context>

<pallas_src>
import functools
import math

import jax
import jax.numpy as jnp
from jax import lax
from jax.experimental import pallas as pl
from jax.experimental.pallas import tpu as pltpu


def _round_up(x, m):
    return (x + m - 1) // m * m


def _vmem_capacity_bytes():
    """Physical VMEM per TensorCore (v5e/v6e: 128 MiB, v7x: 64 MiB)."""
    try:
        return int(pltpu.get_tpu_info().vmem_capacity_bytes)
    except Exception:
        return 64 * 1024 * 1024  # conservative default (v7x per-core size)


def _sublane_multiple(*arrays):
    """Native sublane packing for the narrowest participating dtype."""
    itemsize = min(jnp.dtype(a.dtype).itemsize for a in arrays)
    return {4: 8, 2: 16, 1: 32}.get(itemsize, 8)


# ----------------------------------------------------------------------------- kernels
def _hn_math(x, wd, bd, gamma, beta, eps):
    """dense -> exact erf-gelu -> layernorm, all accumulation/statistics in f32."""
    h = jnp.dot(x, wd, preferred_element_type=jnp.float32)
    h = h + bd.astype(jnp.float32)
    inv_sqrt2 = jnp.float32(1.0 / math.sqrt(2.0))
    h = jnp.float32(0.5) * h * (jnp.float32(1.0) + lax.erf(h * inv_sqrt2))
    mean = jnp.mean(h, axis=-1, keepdims=True)
    diff = h - mean
    var = jnp.mean(diff * diff, axis=-1, keepdims=True)
    hn = diff * lax.rsqrt(var + jnp.float32(eps))
    return hn * gamma.astype(jnp.float32) + beta.astype(jnp.float32)


def _fused_kernel(x_ref, wd_ref, bd_ref, gamma_ref, beta_ref, wv_ref, bv_ref,
                  out_ref, hn_ref, *, eps):
    j = pl.program_id(1)

    @pl.when(j == 0)
    def _():
        hn = _hn_math(x_ref[...].astype(wd_ref.dtype), wd_ref[...],
                      bd_ref[...], gamma_ref[...], beta_ref[...], eps)
        # hn scratch stored in the MXU feed dtype (e.g. bf16): halves scratch VMEM
        # and per-vocab-tile load traffic, and removes the per-step cast.
        hn_ref[...] = hn.astype(hn_ref.dtype)

    o = jnp.dot(hn_ref[...], wv_ref[...], preferred_element_type=jnp.float32)
    out_ref[...] = (o + bv_ref[...].astype(jnp.float32)).astype(out_ref.dtype)


def _hn_prepass_kernel(x_ref, wd_ref, bd_ref, gamma_ref, beta_ref, hn_ref, *, eps):
    hn = _hn_math(x_ref[...].astype(wd_ref.dtype), wd_ref[...],
                  bd_ref[...], gamma_ref[...], beta_ref[...], eps)
    hn_ref[...] = hn.astype(hn_ref.dtype)


def _decoder_kernel(hn_ref, wv_ref, bv_ref, out_ref):
    o = jnp.dot(hn_ref[...], wv_ref[...], preferred_element_type=jnp.float32)
    out_ref[...] = (o + bv_ref[...].astype(jnp.float32)).astype(out_ref.dtype)


# ----------------------------------------------------------------------------- wrapper
def roberta_lm_head2(features, params, *, eps=1e-5, tile_n=None, tile_v=2048,
                     out_dtype=None, split="auto"):
    """features: [B, S, H] -> logits [B, S, V].

    split: "auto" uses the fused kernel when there is a single row tile, else the
    two-kernel form (hn prepass + decoder GEMM with vocab axis outermost) so the
    (H, V) decoder weight streams from HBM exactly once. True/False force either.
    """
    B, S, H = features.shape
    N = B * S
    V = params["w_dec"].shape[1]
    out_dtype = jnp.dtype(out_dtype or features.dtype)

    w_dense, b_dense = params["w_dense"], params["b_dense"]
    gamma, beta = params["gamma"], params["beta"]
    w_dec, b_dec = params["w_dec"], params["b_dec"]
    hn_dtype = jnp.dtype(w_dec.dtype)          # MXU feed dtype for the decoder GEMM

    def isz(a):
        return jnp.dtype(a.dtype).itemsize

    # ---- generation-sized tiles ------------------------------------------------
    vmem_cap = _vmem_capacity_bytes()
    vmem_budget = int(0.85 * vmem_cap)         # never request more than physical VMEM
    sub = _sublane_multiple(features, w_dec)   # 8 (f32) / 16 (bf16) / 32 (int8/fp8)

    if tile_n is None:
        # Arithmetic intensity on the streamed decoder weight is ~tile_n FLOPs/byte:
        # 1024 clears the v6e roofline on 128 MiB-VMEM chips, 512 for v7x (64 MiB).
        tile_n = 1024 if vmem_cap >= 96 * 1024 * 1024 else 512
    tile_n = _round_up(max(sub, min(tile_n, _round_up(N, sub))), sub)
    tile_v = _round_up(max(128, min(tile_v, _round_up(V, 128))), 128)

    def vmem_estimate(tn, tv):
        return (2 * tn * H * isz(features)                    # x tile (double buffered)
                + 2 * H * H * isz(w_dense)                    # dense weight
                + 2 * 4 * H * 4                               # biases / gamma / beta
                + 2 * H * tv * isz(w_dec)                     # decoder weight tile
                + 2 * tv * isz(b_dec)                         # decoder bias tile
                + 2 * tn * tv * out_dtype.itemsize            # output tile
                + 2 * tn * H * hn_dtype.itemsize)             # hn scratch / hn tile

    # Shrink tiles if the generation default does not fit this chip's VMEM.
    while vmem_estimate(tile_n, tile_v) > vmem_budget and tile_n > sub:
        tile_n = max(sub, _round_up(tile_n // 2, sub))
    while vmem_estimate(tile_n, tile_v) > vmem_budget and tile_v > 128:
        tile_v = max(128, _round_up(tile_v // 2, 128))

    vmem_limit = int(min(vmem_budget,
                         max(32 * 1024 * 1024,
                             1.5 * vmem_estimate(tile_n, tile_v))))

    Np = _round_up(N, tile_n)
    Vp = _round_up(V, tile_v)

    x2d = features.reshape(N, H)
    if Np != N:
        # NOTE: zero-padded rows become constant after dense+GELU, so LayerNorm sees
        # ~0 variance and scales them by rsqrt(eps) (~316). Values stay finite and the
        # padded rows are sliced off below -- never read the padded region.
        x2d = jnp.pad(x2d, ((0, Np - N), (0, 0)))
    if Vp != V:
        w_dec = jnp.pad(w_dec, ((0, 0), (0, Vp - V)))
        b_dec = jnp.pad(b_dec, ((0, 0), (0, Vp - V)))

    n_row_tiles = Np // tile_n
    n_voc_tiles = Vp // tile_v
    if split == "auto":
        # Fused form re-streams w_dec once per row tile; split streams it once.
        split = n_row_tiles > 1

    def resident_spec(shape, imap, use_buffered):
        # Grid-invariant blocks: one VMEM buffer is enough (no re-DMA), freeing
        # VMEM for larger tile_n / tile_v (most valuable on v7x's 64 MiB budget).
        if use_buffered:
            return pl.BlockSpec(shape, imap, pipeline_mode=pl.Buffered(1))
        return pl.BlockSpec(shape, imap)

    # ---- fused single-call form -------------------------------------------------
    def call_fused(use_buffered):
        cost = pl.CostEstimate(
            flops=int(2 * Np * H * H + 2 * Np * H * Vp + 12 * Np * H),
            transcendentals=int(Np * H),
            # w_dec is re-streamed once per row tile in the fused form.
            bytes_accessed=int(x2d.size * isz(x2d)
                               + w_dense.size * isz(w_dense)
                               + n_row_tiles * w_dec.size * isz(w_dec)
                               + b_dec.size * isz(b_dec)
                               + Np * Vp * out_dtype.itemsize),
        )
        return pl.pallas_call(
            functools.partial(_fused_kernel, eps=eps),
            out_shape=jax.ShapeDtypeStruct((Np, Vp), out_dtype),
            grid_spec=pltpu.PrefetchScalarGridSpec(
                num_scalar_prefetch=0,
                grid=(n_row_tiles, n_voc_tiles),
                in_specs=[
                    pl.BlockSpec((tile_n, H), lambda i, j: (i, 0)),          # x tile
                    resident_spec((H, H), lambda i, j: (0, 0), use_buffered),  # Wd
                    resident_spec((1, H), lambda i, j: (0, 0), use_buffered),  # bd
                    resident_spec((1, H), lambda i, j: (0, 0), use_buffered),  # gamma
                    resident_spec((1, H), lambda i, j: (0, 0), use_buffered),  # beta
                    pl.BlockSpec((H, tile_v), lambda i, j: (0, j)),          # Wv tile
                    pl.BlockSpec((1, tile_v), lambda i, j: (0, j)),          # bv tile
                ],
                out_specs=pl.BlockSpec((tile_n, tile_v), lambda i, j: (i, j)),
                scratch_shapes=[pltpu.VMEM((tile_n, H), hn_dtype)],
            ),
            compiler_params=pltpu.CompilerParams(
                # vocab axis must stay "arbitrary": the hn scratch written at j == 0
                # is consumed by every later j of the same row tile.
                dimension_semantics=("parallel", "arbitrary"),
                vmem_limit_bytes=vmem_limit),
            cost_estimate=cost,
        )(x2d, w_dense, b_dense, gamma, beta, w_dec, b_dec)

    # ---- two-call form: hn prepass + decoder GEMM --------------------------------
    def call_prepass(use_buffered):
        cost = pl.CostEstimate(
            flops=int(2 * Np * H * H + 12 * Np * H),
            transcendentals=int(Np * H),
            bytes_accessed=int(x2d.size * isz(x2d) + w_dense.size * isz(w_dense)
                               + Np * H * hn_dtype.itemsize),
        )
        return pl.pallas_call(
            functools.partial(_hn_prepass_kernel, eps=eps),
            out_shape=jax.ShapeDtypeStruct((Np, H), hn_dtype),
            grid_spec=pltpu.PrefetchScalarGridSpec(
                num_scalar_prefetch=0,
                grid=(n_row_tiles,),
                in_specs=[
                    pl.BlockSpec((tile_n, H), lambda i: (i, 0)),
                    resident_spec((H, H), lambda i: (0, 0), use_buffered),
                    resident_spec((1, H), lambda i: (0, 0), use_buffered),
                    resident_spec((1, H), lambda i: (0, 0), use_buffered),
                    resident_spec((1, H), lambda i: (0, 0), use_buffered),
                ],
                out_specs=pl.BlockSpec((tile_n, H), lambda i: (i, 0)),
            ),
            compiler_params=pltpu.CompilerParams(
                dimension_semantics=("parallel",),
                vmem_limit_bytes=vmem_limit),
            cost_estimate=cost,
        )(x2d, w_dense, b_dense, gamma, beta)

    def call_decoder(hn2d):
        cost = pl.CostEstimate(
            flops=int(2 * Np * H * Vp),
            transcendentals=0,
            # vocab-tile axis is outermost: each w_dec tile is DMA'd once overall,
            # while the small hn (N x H) is re-read once per vocab tile.
            bytes_accessed=int(w_dec.size * isz(w_dec)
                               + n_voc_tiles * hn2d.size * isz(hn2d)
                               + b_dec.size * isz(b_dec)
                               + Np * Vp * out_dtype.itemsize),
        )
        return pl.pallas_call(
            _decoder_kernel,
            out_shape=jax.ShapeDtypeStruct((Np, Vp), out_dtype),
            grid_spec=pltpu.PrefetchScalarGridSpec(
                num_scalar_prefetch=0,
                grid=(n_voc_tiles, n_row_tiles),   # vocab outer, rows inner: the
                in_specs=[                         # w_dec block is revisited (no
                    pl.BlockSpec((tile_n, H), lambda j, i: (i, 0)),   # re-DMA) over i
                    pl.BlockSpec((H, tile_v), lambda j, i: (0, j)),
                    pl.BlockSpec((1, tile_v), lambda j, i: (0, j)),
                ],
                out_specs=pl.BlockSpec((tile_n, tile_v), lambda j, i: (i, j)),
            ),
            compiler_params=pltpu.CompilerParams(
                dimension_semantics=("parallel", "parallel"),
                vmem_limit_bytes=vmem_limit),
            cost_estimate=cost,
        )(hn2d, w_dec, b_dec)

    if split:
        try:
            hn2d = call_prepass(True)
        except Exception:  # pl.Buffered(1)/pipeline_mode unsupported on this jax build
            hn2d = call_prepass(False)
        out2d = call_decoder(hn2d)
    else:
        try:
            out2d = call_fused(True)
        except Exception:  # pl.Buffered(1)/pipeline_mode unsupported on this jax build
            out2d = call_fused(False)

    return out2d[:N, :V].reshape(B, S, V)


# ----------------------------------------------------------------------------- helpers
def init_params(key, hidden_size, vocab_size, dtype=jnp.float32):
    """Deterministic synthetic parameters matching the module's shapes.

    PyTorch Linear stores weight as [out, in]; we keep the math-friendly
    [in, out] layout directly (equivalent to using W^T)."""
    k1, k2, k3 = jax.random.split(key, 3)
    w_dense = jax.random.normal(k1, (hidden_size, hidden_size), dtype) * 0.02
    b_dense = jax.random.normal(k2, (1, hidden_size), dtype) * 0.02
    gamma = jnp.ones((1, hidden_size), dtype)
    beta = jnp.zeros((1, hidden_size), dtype)
    w_dec = jax.random.normal(k3, (hidden_size, vocab_size), dtype) * 0.02
    b_dec = jnp.zeros((1, vocab_size), dtype)   # self.bias = zeros(avar_vocab_size)
    return {"w_dense": w_dense, "b_dense": b_dense, "gamma": gamma,
            "beta": beta, "w_dec": w_dec, "b_dec": b_dec}


def reference(features, params, eps=1e-5):
    x = features.astype(jnp.float32)
    h = x @ params["w_dense"].astype(jnp.float32) + params["b_dense"][0].astype(jnp.float32)
    h = 0.5 * h * (1.0 + lax.erf(h / jnp.sqrt(2.0)))
    mean = jnp.mean(h, axis=-1, keepdims=True)
    var = jnp.mean((h - mean) ** 2, axis=-1, keepdims=True)
    hn = (h - mean) * lax.rsqrt(var + eps)
    hn = hn * params["gamma"][0].astype(jnp.float32) + params["beta"][0].astype(jnp.float32)
    return hn @ params["w_dec"].astype(jnp.float32) + params["b_dec"][0].astype(jnp.float32)


if __name__ == "__main__":
    # config: hidden_size=32, layer_norm_eps=1e-5, avar_vocab_size=256
    B, S, H, V = 2, 8, 32, 256
    eps = 1e-5

    key = jax.random.PRNGKey(0)
    k_feat, k_par = jax.random.split(key)
    features = jax.random.normal(k_feat, (B, S, H), jnp.float32)
    params = init_params(k_par, H, V)

    ref = reference(features, params, eps=eps)

    # f32, fused path (single row tile at this size).
    out = jax.block_until_ready(roberta_lm_head2(features, params, eps=eps))
    assert out.shape == (B, S, V)
    assert jnp.allclose(out, ref.astype(out.dtype), atol=1e-4, rtol=1e-4), "f32 fused mismatch"

    # f32, forced two-kernel split (hn prepass + vocab-outer decoder GEMM).
    out_split = jax.block_until_ready(
        roberta_lm_head2(features, params, eps=eps, split=True))
    assert jnp.allclose(out_split, ref.astype(out_split.dtype), atol=1e-4, rtol=1e-4), \
        "f32 split mismatch"

    # bf16 weights/activations with bf16 logits (recommended production path on v6e).
    params_bf16 = jax.tree_util.tree_map(lambda p: p.astype(jnp.bfloat16), params)
    out_bf16 = jax.block_until_ready(
        roberta_lm_head2(features.astype(jnp.bfloat16), params_bf16, eps=eps,
                         out_dtype=jnp.bfloat16))
    assert out_bf16.shape == (B, S, V) and out_bf16.dtype == jnp.bfloat16
    assert jnp.allclose(out_bf16.astype(jnp.float32), ref, atol=5e-2, rtol=5e-2), \
        "bf16 fused mismatch"

    # bf16, forced split path.
    out_bf16_split = jax.block_until_ready(
        roberta_lm_head2(features.astype(jnp.bfloat16), params_bf16, eps=eps,
                         out_dtype=jnp.bfloat16, split=True))
    assert jnp.allclose(out_bf16_split.astype(jnp.float32), ref, atol=5e-2, rtol=5e-2), \
        "bf16 split mismatch"

    print("KERNEL_OK")
</pallas_src>

<mosaic_0001>
module attributes {stable_mosaic.version = 11 : i64} {
  func.func @_fused_kernel(%arg0: i32, %arg1: i32, %arg2: memref<16x32xf32, #tpu.memory_space<vmem>>, %arg3: memref<32x32xf32, #tpu.memory_space<vmem>>, %arg4: memref<1x32xf32, #tpu.memory_space<vmem>>, %arg5: memref<1x32xf32, #tpu.memory_space<vmem>>, %arg6: memref<1x32xf32, #tpu.memory_space<vmem>>, %arg7: memref<32x256xf32, #tpu.memory_space<vmem>>, %arg8: memref<1x256xf32, #tpu.memory_space<vmem>>, %arg9: memref<16x256xf32, #tpu.memory_space<vmem>>, %arg10: memref<16x32xf32, #tpu.memory_space<vmem>>) attributes {dimension_semantics = [#tpu.dimension_semantics<parallel>, #tpu.dimension_semantics<arbitrary>], iteration_bounds = array<i64: 1, 1>, scalar_prefetch = 0 : i64, scratch_operands = 1 : i64, tpu.core_type = #tpu.core_type<tc>, window_params = [{transform_indices = @transform_0, window_bounds = array<i64: 16, 32>}, {pipeline_mode = #tpu.pipeline_mode<synchronous>, transform_indices = @transform_1, window_bounds = array<i64: 32, 32>}, {pipeline_mode = #tpu.pipeline_mode<synchronous>, transform_indices = @transform_2, window_bounds = array<i64: 1, 32>}, {pipeline_mode = #tpu.pipeline_mode<synchronous>, transform_indices = @transform_3, window_bounds = array<i64: 1, 32>}, {pipeline_mode = #tpu.pipeline_mode<synchronous>, transform_indices = @transform_4, window_bounds = array<i64: 1, 32>}, {transform_indices = @transform_5, window_bounds = array<i64: 32, 256>}, {transform_indices = @transform_6, window_bounds = array<i64: 1, 256>}, {transform_indices = @transform_7, window_bounds = array<i64: 16, 256>}]} {
    %c0_i32 = arith.constant 0 : i32
    %0 = arith.cmpi eq, %arg1, %c0_i32 : i32
    %1 = arith.extui %0 : i1 to i32
    %c0_i32_0 = arith.constant 0 : i32
    %2 = arith.cmpi ne, %1, %c0_i32_0 : i32
    scf.if %2 {
      %c0_8 = arith.constant 0 : index
      %c0_9 = arith.constant 0 : index
      %10 = vector.load %arg2[%c0_8, %c0_9] : memref<16x32xf32, #tpu.memory_space<vmem>>, vector<16x32xf32>
      %c0_10 = arith.constant 0 : index
      %c0_11 = arith.constant 0 : index
      %11 = vector.load %arg3[%c0_10, %c0_11] : memref<32x32xf32, #tpu.memory_space<vmem>>, vector<32x32xf32>
      %c0_12 = arith.constant 0 : index
      %c0_13 = arith.constant 0 : index
      %12 = vector.load %arg4[%c0_12, %c0_13] : memref<1x32xf32, #tpu.memory_space<vmem>>, vector<1x32xf32>
      %c0_14 = arith.constant 0 : index
      %c0_15 = arith.constant 0 : index
      %13 = vector.load %arg5[%c0_14, %c0_15] : memref<1x32xf32, #tpu.memory_space<vmem>>, vector<1x32xf32>
      %c0_16 = arith.constant 0 : index
      %c0_17 = arith.constant 0 : index
      %14 = vector.load %arg6[%c0_16, %c0_17] : memref<1x32xf32, #tpu.memory_space<vmem>>, vector<1x32xf32>
      %cst_18 = arith.constant dense<0.000000e+00> : vector<16x32xf32>
      %15 = tpu.matmul %10, %11, %cst_18 {dimension_numbers = #tpu.dot_dimension_numbers<[1], [0], [0], [1], [0, 0, 1, 1], [], []>} : vector<16x32xf32>, vector<32x32xf32>, vector<16x32xf32> -> vector<16x32xf32>
      %16 = vector.broadcast %12 : vector<1x32xf32> to vector<16x32xf32>
      %17 = arith.addf %15, %16 : vector<16x32xf32>
      %cst_19 = arith.constant 5.000000e-01 : f32
      %18 = vector.broadcast %cst_19 : f32 to vector<16x32xf32>
      %19 = arith.mulf %18, %17 : vector<16x32xf32>
      %cst_20 = arith.constant 0.707106769 : f32
      %20 = vector.broadcast %cst_20 : f32 to vector<16x32xf32>
      %21 = arith.mulf %17, %20 : vector<16x32xf32>
      %22 = math.erf %21 : vector<16x32xf32>
      %cst_21 = arith.constant 1.000000e+00 : f32
      %23 = vector.broadcast %cst_21 : f32 to vector<16x32xf32>
      %24 = arith.addf %23, %22 : vector<16x32xf32>
      %25 = arith.mulf %19, %24 : vector<16x32xf32>
      %cst_22 = arith.constant dense<0.000000e+00> : vector<16xf32>
      %26 = vector.multi_reduction <add>, %25, %cst_22 [1] : vector<16x32xf32> to vector<16xf32>
      %27 = vector.shape_cast %26 : vector<16xf32> to vector<16x1xf32>
      %cst_23 = arith.constant 3.200000e+01 : f32
      %28 = vector.broadcast %cst_23 : f32 to vector<16x1xf32>
      %29 = arith.divf %27, %28 : vector<16x1xf32>
      %30 = vector.broadcast %29 : vector<16x1xf32> to vector<16x32xf32>
      %31 = arith.subf %25, %30 : vector<16x32xf32>
      %32 = arith.mulf %31, %31 : vector<16x32xf32>
      %cst_24 = arith.constant dense<0.000000e+00> : vector<16xf32>
      %33 = vector.multi_reduction <add>, %32, %cst_24 [1] : vector<16x32xf32> to vector<16xf32>
      %34 = vector.shape_cast %33 : vector<16xf32> to vector<16x1xf32>
      %cst_25 = arith.constant 3.200000e+01 : f32
      %35 = vector.broadcast %cst_25 : f32 to vector<16x1xf32>
      %36 = arith.divf %34, %35 : vector<16x1xf32>
      %cst_26 = arith.constant 9.99999974E-6 : f32
      %37 = vector.broadcast %cst_26 : f32 to vector<16x1xf32>
      %38 = arith.addf %36, %37 : vector<16x1xf32>
      %39 = math.rsqrt %38 : vector<16x1xf32>
      %40 = vector.broadcast %39 : vector<16x1xf32> to vector<16x32xf32>
      %41 = arith.mulf %31, %40 : vector<16x32xf32>
      %42 = vector.broadcast %13 : vector<1x32xf32> to vector<16x32xf32>
      %43 = arith.mulf %41, %42 : vector<16x32xf32>
      %44 = vector.broadcast %14 : vector<1x32xf32> to vector<16x32xf32>
      %45 = arith.addf %43, %44 : vector<16x32xf32>
      %c0_27 = arith.constant 0 : index
      %c0_28 = arith.constant 0 : index
      %46 = vector.load %arg10[%c0_27, %c0_28] : memref<16x32xf32, #tpu.memory_space<vmem>>, vector<16x32xf32>
      tpu.vector_store %arg10[%c0_27, %c0_28], %45 {strides = array<i32>} : memref<16x32xf32, #tpu.memory_space<vmem>>, vector<16x32xf32>,
    } else {
    }
    %c0 = arith.constant 0 : index
    %c0_1 = arith.constant 0 : index
    %3 = vector.load %arg10[%c0, %c0_1] : memref<16x32xf32, #tpu.memory_space<vmem>>, vector<16x32xf32>
    %c0_2 = arith.constant 0 : index
    %c0_3 = arith.constant 0 : index
    %4 = vector.load %arg7[%c0_2, %c0_3] : memref<32x256xf32, #tpu.memory_space<vmem>>, vector<32x256xf32>
    %cst = arith.constant dense<0.000000e+00> : vector<16x256xf32>
    %5 = tpu.matmul %3, %4, %cst {dimension_numbers = #tpu.dot_dimension_numbers<[1], [0], [0], [1], [0, 0, 1, 1], [], []>} : vector<16x32xf32>, vector<32x256xf32>, vector<16x256xf32> -> vector<16x256xf32>
    %c0_4 = arith.constant 0 : index
    %c0_5 = arith.constant 0 : index
    %6 = vector.load %arg8[%c0_4, %c0_5] : memref<1x256xf32, #tpu.memory_space<vmem>>, vector<1x256xf32>
    %7 = vector.broadcast %6 : vector<1x256xf32> to vector<16x256xf32>
    %8 = arith.addf %5, %7 : vector<16x256xf32>
    %c0_6 = arith.constant 0 : index
    %c0_7 = arith.constant 0 : index
    %9 = vector.load %arg9[%c0_6, %c0_7] : memref<16x256xf32, #tpu.memory_space<vmem>>, vector<16x256xf32>
    tpu.vector_store %arg9[%c0_6, %c0_7], %8 {strides = array<i32>} : memref<16x256xf32, #tpu.memory_space<vmem>>, vector<16x256xf32>,
    return
  }
  func.func @transform_0(%arg0: i32, %arg1: i32) -> (i32, i32) {
    %c0_i32 = arith.constant 0 : i32
    %c0_i32_0 = arith.constant 0 : i32
    return %arg0, %c0_i32 : i32, i32
  }
  func.func @transform_1(%arg0: i32, %arg1: i32) -> (i32, i32) {
    %c0_i32 = arith.constant 0 : i32
    %c0_i32_0 = arith.constant 0 : i32
    %c0_i32_1 = arith.constant 0 : i32
    return %c0_i32, %c0_i32_0 : i32, i32
  }
  func.func @transform_2(%arg0: i32, %arg1: i32) -> (i32, i32) {
    %c0_i32 = arith.constant 0 : i32
    %c0_i32_0 = arith.constant 0 : i32
    %c0_i32_1 = arith.constant 0 : i32
    return %c0_i32, %c0_i32_0 : i32, i32
  }
  func.func @transform_3(%arg0: i32, %arg1: i32) -> (i32, i32) {
    %c0_i32 = arith.constant 0 : i32
    %c0_i32_0 = arith.constant 0 : i32
    %c0_i32_1 = arith.constant 0 : i32
    return %c0_i32, %c0_i32_0 : i32, i32
  }
  func.func @transform_4(%arg0: i32, %arg1: i32) -> (i32, i32) {
    %c0_i32 = arith.constant 0 : i32
    %c0_i32_0 = arith.constant 0 : i32
    %c0_i32_1 = arith.constant 0 : i32
    return %c0_i32, %c0_i32_0 : i32, i32
  }
  func.func @transform_5(%arg0: i32, %arg1: i32) -> (i32, i32) {
    %c0_i32 = arith.constant 0 : i32
    %c0_i32_0 = arith.constant 0 : i32
    return %c0_i32, %arg1 : i32, i32
  }
  func.func @transform_6(%arg0: i32, %arg1: i32) -> (i32, i32) {
    %c0_i32 = arith.constant 0 : i32
    %c0_i32_0 = arith.constant 0 : i32
    return %c0_i32, %arg1 : i32, i32
  }
  func.func @transform_7(%arg0: i32, %arg1: i32) -> (i32, i32) {
    %c0_i32 = arith.constant 0 : i32
    return %arg0, %arg1 : i32, i32
  }
}

module attributes {stable_mosaic.version = 11 : i64} {
  func.func @_fused_kernel(%arg0: i32, %arg1: i32, %arg2: memref<16x32xf32, #tpu.memory_space<vmem>>, %arg3: memref<32x32xf32, #tpu.memory_space<vmem>>, %arg4: memref<1x32xf32, #tpu.memory_space<vmem>>, %arg5: memref<1x32xf32, #tpu.memory_space<vmem>>, %arg6: memref<1x32xf32, #tpu.memory_space<vmem>>, %arg7: memref<32x256xf32, #tpu.memory_space<vmem>>, %arg8: memref<1x256xf32, #tpu.memory_space<vmem>>, %arg9: memref<16x256xf32, #tpu.memory_space<vmem>>, %arg10: memref<16x32xf32, #tpu.memory_space<vmem>>) attributes {dimension_semantics = [#tpu.dimension_semantics<parallel>, #tpu.dimension_semantics<arbitrary>], iteration_bounds = array<i64: 1, 1>, scalar_prefetch = 0 : i64, scratch_operands = 1 : i64, tpu.core_type = #tpu.core_type<tc>, window_params = [{transform_indices = @transform_0, window_bounds = array<i64: 16, 32>}, {pipeline_mode = #tpu.pipeline_mode<synchronous>, transform_indices = @transform_1, window_bounds = array<i64: 32, 32>}, {pipeline_mode = #tpu.pipeline_mode<synchronous>, transform_indices = @transform_2, window_bounds = array<i64: 1, 32>}, {pipeline_mode = #tpu.pipeline_mode<synchronous>, transform_indices = @transform_3, window_bounds = array<i64: 1, 32>}, {pipeline_mode = #tpu.pipeline_mode<synchronous>, transform_indices = @transform_4, window_bounds = array<i64: 1, 32>}, {transform_indices = @transform_5, window_bounds = array<i64: 32, 256>}, {transform_indices = @transform_6, window_bounds = array<i64: 1, 256>}, {transform_indices = @transform_7, window_bounds = array<i64: 16, 256>}]} {
    %c0_i32 = arith.constant 0 : i32
    %0 = arith.cmpi eq, %arg1, %c0_i32 : i32
    %1 = arith.extui %0 : i1 to i32
    %c0_i32_0 = arith.constant 0 : i32
    %2 = arith.cmpi ne, %1, %c0_i32_0 : i32
    scf.if %2 {
      %c0_8 = arith.constant 0 : index
      %c0_9 = arith.constant 0 : index
      %10 = vector.load %arg2[%c0_8, %c0_9] : memref<16x32xf32, #tpu.memory_space<vmem>>, vector<16x32xf32>
      %c0_10 = arith.constant 0 : index
      %c0_11 = arith.constant 0 : index
      %11 = vector.load %arg3[%c0_10, %c0_11] : memref<32x32xf32, #tpu.memory_space<vmem>>, vector<32x32xf32>
      %c0_12 = arith.constant 0 : index
      %c0_13 = arith.constant 0 : index
      %12 = vector.load %arg4[%c0_12, %c0_13] : memref<1x32xf32, #tpu.memory_space<vmem>>, vector<1x32xf32>
      %c0_14 = arith.constant 0 : index
      %c0_15 = arith.constant 0 : index
      %13 = vector.load %arg5[%c0_14, %c0_15] : memref<1x32xf32, #tpu.memory_space<vmem>>, vector<1x32xf32>
      %c0_16 = arith.constant 0 : index
      %c0_17 = arith.constant 0 : index
      %14 = vector.load %arg6[%c0_16, %c0_17] : memref<1x32xf32, #tpu.memory_space<vmem>>, vector<1x32xf32>
      %cst_18 = arith.constant dense<0.000000e+00> : vector<16x32xf32>
      %15 = tpu.matmul %10, %11, %cst_18 {dimension_numbers = #tpu.dot_dimension_numbers<[1], [0], [0], [1], [0, 0, 1, 1], [], []>} : vector<16x32xf32>, vector<32x32xf32>, vector<16x32xf32> -> vector<16x32xf32>
      %16 = vector.broadcast %12 : vector<1x32xf32> to vector<16x32xf32>
      %17 = arith.addf %15, %16 : vector<16x32xf32>
      %cst_19 = arith.constant 5.000000e-01 : f32
      %18 = vector.broadcast %cst_19 : f32 to vector<16x32xf32>
      %19 = arith.mulf %18, %17 : vector<16x32xf32>
      %cst_20 = arith.constant 0.707106769 : f32
      %20 = vector.broadcast %cst_20 : f32 to vector<16x32xf32>
      %21 = arith.mulf %17, %20 : vector<16x32xf32>
      %22 = math.erf %21 : vector<16x32xf32>
      %cst_21 = arith.constant 1.000000e+00 : f32
      %23 = vector.broadcast %cst_21 : f32 to vector<16x32xf32>
      %24 = arith.addf %23, %22 : vector<16x32xf32>
      %25 = arith.mulf %19, %24 : vector<16x32xf32>
      %cst_22 = arith.constant dense<0.000000e+00> : vector<16xf32>
      %26 = vector.multi_reduction <add>, %25, %cst_22 [1] : vector<16x32xf32> to vector<16xf32>
      %27 = vector.shape_cast %26 : vector<16xf32> to vector<16x1xf32>
      %cst_23 = arith.constant 3.200000e+01 : f32
      %28 = vector.broadcast %cst_23 : f32 to vector<16x1xf32>
      %29 = arith.divf %27, %28 : vector<16x1xf32>
      %30 = vector.broadcast %29 : vector<16x1xf32> to vector<16x32xf32>
      %31 = arith.subf %25, %30 : vector<16x32xf32>
      %32 = arith.mulf %31, %31 : vector<16x32xf32>
      %cst_24 = arith.constant dense<0.000000e+00> : vector<16xf32>
      %33 = vector.multi_reduction <add>, %32, %cst_24 [1] : vector<16x32xf32> to vector<16xf32>
      %34 = vector.shape_cast %33 : vector<16xf32> to vector<16x1xf32>
      %cst_25 = arith.constant 3.200000e+01 : f32
      %35 = vector.broadcast %cst_25 : f32 to vector<16x1xf32>
      %36 = arith.divf %34, %35 : vector<16x1xf32>
      %cst_26 = arith.constant 9.99999974E-6 : f32
      %37 = vector.broadcast %cst_26 : f32 to vector<16x1xf32>
      %38 = arith.addf %36, %37 : vector<16x1xf32>
      %39 = math.rsqrt %38 : vector<16x1xf32>
      %40 = vector.broadcast %39 : vector<16x1xf32> to vector<16x32xf32>
      %41 = arith.mulf %31, %40 : vector<16x32xf32>
      %42 = vector.broadcast %13 : vector<1x32xf32> to vector<16x32xf32>
      %43 = arith.mulf %41, %42 : vector<16x32xf32>
      %44 = vector.broadcast %14 : vector<1x32xf32> to vector<16x32xf32>
      %45 = arith.addf %43, %44 : vector<16x32xf32>
      %c0_27 = arith.constant 0 : index
      %c0_28 = arith.constant 0 : index
      %46 = vector.load %arg10[%c0_27, %c0_28] : memref<16x32xf32, #tpu.memory_space<vmem>>, vector<16x32xf32>
      tpu.vector_store %arg10[%c0_27, %c0_28], %45 {strides = array<i32>} : memref<16x32xf32, #tpu.memory_space<vmem>>, vector<16x32xf32>,
    } else {
    }
    %c0 = arith.constant 0 : index
    %c0_1 = arith.constant 0 : index
    %3 = vector.load %arg10[%c0, %c0_1] : memref<16x32xf32, #tpu.memory_space<vmem>>, vector<16x32xf32>
    %c0_2 = arith.constant 0 : index
    %c0_3 = arith.constant 0 : index
    %4 = vector.load %arg7[%c0_2, %c0_3] : memref<32x256xf32, #tpu.memory_space<vmem>>, vector<32x256xf32>
    %cst = arith.constant dense<0.000000e+00> : vector<16x256xf32>
    %5 = tpu.matmul %3, %4, %cst {dimension_numbers = #tpu.dot_dimension_numbers<[1], [0], [0], [1], [0, 0, 1, 1], [], []>} : vector<16x32xf32>, vector<32x256xf32>, vector<16x256xf32> -> vector<16x256xf32>
    %c0_4 = arith.constant 0 : index
    %c0_5 = arith.constant 0 : index
    %6 = vector.load %arg8[%c0_4, %c0_5] : memref<1x256xf32, #tpu.memory_space<vmem>>, vector<1x256xf32>
    %7 = vector.broadcast %6 : vector<1x256xf32> to vector<16x256xf32>
    %8 = arith.addf %5, %7 : vector<16x256xf32>
    %c0_6 = arith.constant 0 : index
    %c0_7 = arith.constant 0 : index
    %9 = vector.load %arg9[%c0_6, %c0_7] : memref<16x256xf32, #tpu.memory_space<vmem>>, vector<16x256xf32>
    tpu.vector_store %arg9[%c0_6, %c0_7], %8 {strides = array<i32>} : memref<16x256xf32, #tpu.memory_space<vmem>>, vector<16x256xf32>,
    return
  }
  func.func @transform_0(%arg0: i32, %arg1: i32) -> (i32, i32) {
    %c0_i32 = arith.constant 0 : i32
    %c0_i32_0 = arith.constant 0 : i32
    return %arg0, %c0_i32 : i32, i32
  }
  func.func @transform_1(%arg0: i32, %arg1: i32) -> (i32, i32) {
    %c0_i32 = arith.constant 0 : i32
    %c0_i32_0 = arith.constant 0 : i32
    %c0_i32_1 = arith.constant 0 : i32
    return %c0_i32, %c0_i32_0 : i32, i32
  }
  func.func @transform_2(%arg0: i32, %arg1: i32) -> (i32, i32) {
    %c0_i32 = arith.constant 0 : i32
    %c0_i32_0 = arith.constant 0 : i32
    %c0_i32_1 = arith.constant 0 : i32
    return %c0_i32, %c0_i32_0 : i32, i32
  }
  func.func @transform_3(%arg0: i32, %arg1: i32) -> (i32, i32) {
    %c0_i32 = arith.constant 0 : i32
    %c0_i32_0 = arith.constant 0 : i32
    %c0_i32_1 = arith.constant 0 : i32
    return %c0_i32, %c0_i32_0 : i32, i32
  }
  func.func @transform_4(%arg0: i32, %arg1: i32) -> (i32, i32) {
    %c0_i32 = arith.constant 0 : i32
    %c0_i32_0 = arith.constant 0 : i32
    %c0_i32_1 = arith.constant 0 : i32
    return %c0_i32, %c0_i32_0 : i32, i32
  }
  func.func @transform_5(%arg0: i32, %arg1: i32) -> (i32, i32) {
    %c0_i32 = arith.constant 0 : i32
    %c0_i32_0 = arith.constant 0 : i32
    return %c0_i32, %arg1 : i32, i32
  }
  func.func @transform_6(%arg0: i32, %arg1: i32) -> (i32, i32) {
    %c0_i32 = arith.constant 0 : i32
    %c0_i32_0 = arith.constant 0 : i32
    return %c0_i32, %arg1 : i32, i32
  }
  func.func @transform_7(%arg0: i32, %arg1: i32) -> (i32, i32) {
    %c0_i32 = arith.constant 0 : i32
    return %arg0, %arg1 : i32, i32
  }
}

</mosaic_0001>

<bundles_post_ra>
// kernel: tpu_custom_call.1
= control target key start
LH: loop header
LB: loop body
LE: loop exit
PB: predicated region body
PF: predicated region fallthrough
CT: control target
= control target key end

     0   :  { %12 = vsyncpa [#allocation4], 0  ;;  %s568_s0 = inlined_call_operand.hbm [shape: f32[16,32], index: 0, kind: input, shape index: {}]   ;;  %s569_s1 = inlined_call_operand.hbm [shape: f32[32,32], index: 1, kind: input, shape index: {}]   ;;  %s570_s2 = inlined_call_operand.vmem [shape: f32[1,32], index: 2, kind: input, shape index: {}]   ;;  %s571_s3 = inlined_call_operand.vmem [shape: f32[1,32], index: 3, kind: input, shape index: {}]   ;;  %s572_s4 = inlined_call_operand.vmem [shape: f32[1,32], index: 4, kind: input, shape index: {}]   ;;  %s573_s5 = inlined_call_operand.hbm [shape: f32[32,256], index: 5, kind: input, shape index: {}]   ;;  %s574_s6 = inlined_call_operand.vmem [shape: f32[1,256], index: 6, kind: input, shape index: {}]   ;;  %s575_s7 = inlined_call_operand.hbm [shape: f32[16,256], index: 7, kind: output, shape index: {}]  }
   0x1   :  { %13 = vsyncpa [#allocation7], 0 }
   0x2   :  { %14 = vsyncpa [#allocation5], 0  ;;  %s479_s24 = smov [#allocation6]   ;;  %s480_s26 = smov [#allocation3]  }
   0x3   :  { %s32_s25 = sshll.u32 %s479_s24, 4  ;;  %s20_s27 = sshll.u32 %s480_s26, 4  ;;  %s33_s25 = int_to_ptr.vmem [resolvable:$true] %s32_s25  ;;  %s21_s27 = int_to_ptr.vmem [resolvable:$true] %s20_s27 }
   0x4   :  { %s401_s28 = scalar_lea.vmem %s33_s25, 512  ;;  %p406_p1 = scmp.lt.s32.totalorder %s33_s25, %s33_s25 }
   0x5   :  { %p402_p0 = scmp.ne.s32.totalorder %s33_s25, %s401_s28  ;;  %p407_p2 = scmp.lt.s32.totalorder %s401_s28, %s401_s28 }
   0x7   :  { %p408_p3 = por %p407_p2, %p406_p1 }
   0x9   :  { %p409_p4 = pnand %p408_p3, %p402_p0 }
   0xb   :  { %412 = shalt.err (!%p409_p4)
}
   0xc   :  { %s481_s29 = smov 128   ;;  %s482_s30 = smov 8  }
   0xd   :  { %38 = dma.hbm_to_vmem [thread:$0]  %s569_s1, 512, %s33_s25, [#allocation7], %s481_s29, %s481_s29, %s482_s30  }
   0xe   :  { %s421_s10 = scalar_lea.vmem %s21_s27, 256  ;;  %p426_p6 = scmp.lt.s32.totalorder %s21_s27, %s21_s27 }
   0xf   :  { %p422_p5 = scmp.ne.s32.totalorder %s21_s27, %s421_s10  ;;  %p427_p7 = scmp.lt.s32.totalorder %s421_s10, %s421_s10 }
  0x11   :  { %p428_p8 = por %p427_p7, %p426_p6 }
  0x13   :  { %p429_p9 = pnand %p428_p8, %p422_p5 }
  0x15   :  { %432 = shalt.err (!%p429_p9)
}
  0x16   :  { %26 = dma.hbm_to_vmem [thread:$0]  %s568_s0, 256, %s21_s27, [#allocation4], %s481_s29, %s481_s29, %s482_s30  }
  0x17   :  { %s483_s13 = smov [#allocation8]  }
  0x18   :  { %s50_s14 = sshll.u32 %s483_s13, 4  ;;  %s51_s14 = int_to_ptr.vmem [resolvable:$true] %s50_s14 }
  0x19   :  { %s441_s15 = scalar_lea.vmem %s51_s14, 1024  ;;  %p446_p11 = scmp.lt.s32.totalorder %s51_s14, %s51_s14 }
  0x1a   :  { %p442_p10 = scmp.ne.s32.totalorder %s51_s14, %s441_s15  ;;  %p447_p12 = scmp.lt.s32.totalorder %s441_s15, %s441_s15 }
  0x1c   :  { %p448_p13 = por %p447_p12, %p446_p11 }
  0x1e   :  { %p449_p0 = pnand %p448_p13, %p442_p10 }
  0x20   :  { %452 = shalt.err (!%p449_p0)
}
  0x21   :  { %s484_s1 = smov 256   ;;  %s485_s16 = smov 16  }
  0x22   :  { %56 = dma.hbm_to_vmem [thread:$0]  %s573_s5, 1024, %s51_s14, [#allocation7], %s484_s1, %s484_s1, %s485_s16  }
  0x23   :  { %473 = dma.done.wait [#allocation4], 256  }
  0x24   :  { %474 = vsyncadd [#allocation4], 4294967040 }
  0x25   :  { %475 = dma.done.wait [#allocation7], 1536  }
  0x26   :  { %476 = vsyncadd [#allocation7], 4294965760  ;;  %vm87_vm0 = vcmask 261120   ;;  %v77_v0 = vld [vmem:[#allocation6 + $0x18] sm:$0xff]  ;;  %v76_v1 = vld [vmem:[#allocation6 + $0x10] sm:$0xff]  ;;  %v486_v41 = vmov 0.0   ;;  %v236_v60 = vlaneseq }
  0x27   :  { %365 = vmatprep.subr.mxu0 %v77_v0  ;;  %v72_v2 = vld [vmem:[#allocation3] sm:$0xff]  ;;  %v75_v3 = vld [vmem:[#allocation6 + $0x8] sm:$0xff]  ;;  %v74_v4 = vld [vmem:[#allocation6] sm:$0xff]  ;;  %317 = vmatprep.mubr.f32.mxu1 %v486_v41  ;;  %s487_s22 = smov [#allocation9]  }
  0x28   :  { %366 = vmatpush3.msra.mxu0 %v77_v0  ;;  %373 = vmatprep.mubr.msk.f32.mxu0 %vm87_vm0, %v72_v2  ;;  %v73_v5 = vld [vmem:[#allocation3 + $0x8] sm:$0xff]  ;;  %v352_v6 = vld [vmem:[%s570_s2] ss:$0 sm:$0xff]  ;;  %v232_v34 = vld [vmem:[#allocation8 + $0x30] sm:$0xff]  ;;  %v237_v61 = vshrl.u32 %v236_v60, 7  ;;  %s339_s23 = sshll.u32 %s487_s22, 4  ;;  %s340_s23 = int_to_ptr.vmem [resolvable:$true] %s339_s23 }
  0x29   :  { %367 = vmatprep.subr.mxu0 %v76_v1  ;;  %v233_v33 = vld [vmem:[#allocation8 + $0x38] sm:$0xff]  ;;  %v231_v35 = vld [vmem:[#allocation8 + $0x28] sm:$0xff]  ;;  %v230_v36 = vld [vmem:[#allocation8 + $0x20] sm:$0xff]  ;;  %s453_s24 = scalar_lea.vmem %s340_s23, 512  ;;  %p458_p2 = scmp.lt.s32.totalorder %s340_s23, %s340_s23 }
  0x2a   :  { %368 = vmatpush3.msra.mxu0 %v76_v1  ;;  %277 = vmatprep.subr.mxu1 %v233_v33  ;;  %v229_v37 = vld [vmem:[#allocation8 + $0x18] sm:$0xff]  ;;  %v228_v38 = vld [vmem:[#allocation8 + $0x10] sm:$0xff]  ;;  %v227_v39 = vld [vmem:[#allocation8 + $0x8] sm:$0xff]  ;;  %v238_v62 = vsub.s32 0, %v237_v61  ;;  %v242_v0 = vsub.s32 1, %v237_v61  ;;  %p454_p1 = scmp.ne.s32.totalorder %s340_s23, %s453_s24  ;;  %p459_p3 = scmp.lt.s32.totalorder %s453_s24, %s453_s24 }
  0x2b   :  { %369 = vmatprep.subr.mxu0 %v75_v3  ;;  %278 = vmatpush1.msra.mxu1 %v232_v34  ;;  %v226_v40 = vld [vmem:[#allocation8] sm:$0xff] }
  0x2c   :  { %370 = vmatpush3.msra.mxu0 %v75_v3  ;;  %279 = vmatprep.subr.mxu1 %v231_v35  ;;  %v355_v49 = vld [vmem:[%s571_s3] ss:$0 sm:$0xff]  ;;  %p460_p4 = por %p459_p3, %p458_p2 }
  0x2d   :  { %371 = vmatprep.subr.mxu0 %v74_v4  ;;  %280 = vmatpush1.msra.mxu1 %v230_v36  ;;  %v356_v51 = vld [vmem:[%s572_s4] ss:$0 sm:$0xff] }
  0x2e   :  { %372 = vmatpush3.msra.mxu0 %v74_v4  ;;  %281 = vmatprep.subr.mxu1 %v229_v37  ;;  %v234_v63 = vld [vmem:[%s574_s6] sm:$0x3]  ;;  %p461_p5 = pnand %p460_p4, %p454_p1 }
  0x2f   :  { %374 = vmatmul.mubr.msk.f32.vlgmr.msra.gmra.mxu0 %vm87_vm0, %v73_v5  ;;  %282 = vmatpush1.msra.mxu1 %v228_v38  ;;  %v239_v1 = vrot.slane %v234_v63, %v238_v62  ;;  %v243_v2 = vrot.slane %v234_v63, %v242_v0 }
  0x30   :  { %283 = vmatprep.subr.mxu1 %v227_v39 }
  0x31   :  { %284 = vmatpush1.msra.mxu1 %v226_v40 }
  0xef   :  { %v375_v7 = vpop.f32.mrf.mxu0 }
  0xf0   :  { %v166_v8 = vadd.f32 %v375_v7, %v352_v6 }
  0xf1   :  { %v160_v9 = vpop.f32.mrf.mxu0 }
  0xf2   :  { %v172_v10 = vmul.f32 0.70710677, %v166_v8  ;;  %v161_v11 = vadd.f32 %v352_v6, %v160_v9  ;;  %v170_v18 = vmul.f32 0.5, %v166_v8 }
  0xf4   :  { %385 = verf.f32 %v172_v10  ;;  %v171_v12 = vmul.f32 0.70710677, %v161_v11  ;;  %v169_v15 = vmul.f32 0.5, %v161_v11 }
  0xf6   :  { %387 = verf.f32 %v171_v12 }
 0x101   :  { %v386_v13 = vpop.eup %385 }
 0x102   :  { %v176_v17 = vadd.f32 1.0, %v386_v13 }
 0x103   :  { %v388_v14 = vpop.eup %387 }
 0x104   :  { %v175_v16 = vadd.f32 1.0, %v388_v14  ;;  %v178_v21 = vmul.f32 %v176_v17, %v170_v18 }
 0x106   :  { %v177_v19 = vmul.f32 %v175_v16, %v169_v15  ;;  %v182_v22 = vsel %vm87_vm0, %v178_v21, 0.0 }
 0x108   :  { %v179_v20 = vsel %vm87_vm0, %v177_v19, 0.0 }
 0x109   :  { %180 = vadd.xlane.f32.xlu0 %v179_v20 }
 0x10d   :  { %183 = vadd.xlane.f32.xlu0 %v182_v22 }
 0x192   :  { %v181_v23 = vpop.xlane.xlu0 %180 }
 0x193   :  { %v186_v24 = vmul.f32 0.03125, %v181_v23 }
 0x195   :  { %v188_v25 = vsub.f32 %v177_v19, %v186_v24 }
 0x196   :  { %v184_v26 = vpop.xlane.xlu0 %183 }
 0x197   :  { %v187_v27 = vmul.f32 0.03125, %v184_v26  ;;  %v190_v28 = vmul.f32 %v188_v25, %v188_v25 }
 0x199   :  { %v189_v29 = vsub.f32 %v178_v21, %v187_v27  ;;  %v192_v30 = vsel %vm87_vm0, %v190_v28, 0.0 }
 0x19a   :  { %193 = vadd.xlane.f32.xlu1 %v192_v30 }
 0x19b   :  { %v191_v31 = vmul.f32 %v189_v29, %v189_v29 }
 0x19d   :  { %v195_v32 = vsel %vm87_vm0, %v191_v31, 0.0 }
 0x19e   :  { %196 = vadd.xlane.f32.xlu1 %v195_v32 }
 0x223   :  { %v194_v42 = vpop.xlane.xlu1 %193 }
 0x224   :  { %v198_v43 = vmul.f32 0.03125, %v194_v42 }
 0x226   :  { %v200_v44 = vadd.f32 1e-05, %v198_v43 }
 0x227   :  { %v197_v45 = vpop.xlane.xlu1 %196 }
 0x228   :  { %389 = vrsqrt.f32 %v200_v44  ;;  %v199_v46 = vmul.f32 0.03125, %v197_v45 }
 0x22a   :  { %v201_v47 = vadd.f32 1e-05, %v199_v46 }
 0x22c   :  { %391 = vrsqrt.f32 %v201_v47 }
 0x235   :  { %v390_v48 = vpop.eup %389 }
 0x236   :  { %v204_v50 = vmul.f32 %v390_v48, %v188_v25 }
 0x238   :  { %v212_v52 = vmul.f32 %v355_v49, %v204_v50 }
 0x239   :  { %v392_v53 = vpop.eup %391 }
 0x23a   :  { %v220_v54 = vadd.f32 %v356_v51, %v212_v52  ;;  %v205_v55 = vmul.f32 %v392_v53, %v189_v29 }
 0x23c   :  { %222 = vst.msk [vmem:[#allocation2] sm:$0xff] %vm87_vm0, %v220_v54  ;;  %v213_v56 = vmul.f32 %v355_v49, %v205_v55 }
 0x23e   :  { %v221_v57 = vadd.f32 %v356_v51, %v213_v56 }
 0x240   :  { %223 = vst.msk [vmem:[#allocation2 + $0x8] sm:$0xff] %vm87_vm0, %v221_v57 }
 0x243   :  { %v224_v58 = vld [vmem:[#allocation2] sm:$0xff] }
 0x244   :  { %357 = vmatmul.mubr.msk.f32.vlgmr.msra.gmra.mxu1 %vm87_vm0, %v224_v58 }
 0x245   :  { %323 = vmatprep.mubr.f32.mxu1 %v486_v41 }
 0x247   :  { %v225_v59 = vld [vmem:[#allocation2 + $0x8] sm:$0xff] }
 0x248   :  { %358 = vmatmul.mubr.msk.f32.gmra.mxu1 %vm87_vm0, %v225_v59 }
 0x304   :  { %v319_v3 = vpop.f32.mrf.mxu1 }
 0x305   :  { %v320_v4 = vadd.f32 %v319_v3, %v239_v1 }
 0x306   :  { %v321_v5 = vpop.f32.mrf.mxu1 }
 0x307   :  { %330 = vst [vmem:[#allocation9] sm:$0xff] %v320_v4  ;;  %v322_v6 = vadd.f32 %v321_v5, %v243_v2 }
 0x308   :  { %v325_v7 = vpop.f32.mrf.mxu1 }
 0x309   :  { %331 = vst [vmem:[#allocation9 + $0x8] sm:$0xff] %v322_v6  ;;  %v326_v8 = vadd.f32 %v325_v7, %v239_v1 }
 0x30a   :  { %v327_v9 = vpop.f32.mrf.mxu1 }
 0x30b   :  { %332 = vst [vmem:[#allocation9 + $0x10] sm:$0xff] %v326_v8  ;;  %v328_v10 = vadd.f32 %v327_v9, %v243_v2 }
 0x30d   :  { %333 = vst [vmem:[#allocation9 + $0x18] sm:$0xff] %v328_v10 }
 0x30e   :  { %464 = shalt.err (!%p461_p5)
}
 0x30f   :  { %345 = dma.vmem_to_hbm [thread:$0]  %s340_s23, 512, %s575_s7, [#allocation5], %s484_s1, %s484_s1, %s485_s16  }
 0x310   :  { %477 = dma.done.wait [#allocation5], 512  }
 0x311   :  { %478 = vsyncadd [#allocation5], 4294966784 }
 0x312   :  { %349 = vsyncpa [#allocation4], 1 }
 0x313   :  { %350 = vsyncpa [#allocation7], 1 }
 0x314   :  { %351 = vsyncpa [#allocation5], 1 }

// kernel: tpu_custom_call.1
= control target key start
LH: loop header
LB: loop body
LE: loop exit
PB: predicated region body
PF: predicated region fallthrough
CT: control target
= control target key end

     0   :  { %12 = vsyncpa [#allocation4], 0  ;;  %s568_s0 = inlined_call_operand.hbm [shape: f32[16,32], index: 0, kind: input, shape index: {}]   ;;  %s569_s1 = inlined_call_operand.hbm [shape: f32[32,32], index: 1, kind: input, shape index: {}]   ;;  %s570_s2 = inlined_call_operand.vmem [shape: f32[1,32], index: 2, kind: input, shape index: {}]   ;;  %s571_s3 = inlined_call_operand.vmem [shape: f32[1,32], index: 3, kind: input, shape index: {}]   ;;  %s572_s4 = inlined_call_operand.vmem [shape: f32[1,32], index: 4, kind: input, shape index: {}]   ;;  %s573_s5 = inlined_call_operand.hbm [shape: f32[32,256], index: 5, kind: input, shape index: {}]   ;;  %s574_s6 = inlined_call_operand.vmem [shape: f32[1,256], index: 6, kind: input, shape index: {}]   ;;  %s575_s7 = inlined_call_operand.hbm [shape: f32[16,256], index: 7, kind: output, shape index: {}]  }
   0x1   :  { %13 = vsyncpa [#allocation7], 0 }
   0x2   :  { %14 = vsyncpa [#allocation5], 0  ;;  %s479_s24 = smov [#allocation6]   ;;  %s480_s26 = smov [#allocation3]  }
   0x3   :  { %s32_s25 = sshll.u32 %s479_s24, 4  ;;  %s20_s27 = sshll.u32 %s480_s26, 4  ;;  %s33_s25 = int_to_ptr.vmem [resolvable:$true] %s32_s25  ;;  %s21_s27 = int_to_ptr.vmem [resolvable:$true] %s20_s27 }
   0x4   :  { %s401_s28 = scalar_lea.vmem %s33_s25, 512  ;;  %p406_p1 = scmp.lt.s32.totalorder %s33_s25, %s33_s25 }
   0x5   :  { %p402_p0 = scmp.ne.s32.totalorder %s33_s25, %s401_s28  ;;  %p407_p2 = scmp.lt.s32.totalorder %s401_s28, %s401_s28 }
   0x7   :  { %p408_p3 = por %p407_p2, %p406_p1 }
   0x9   :  { %p409_p4 = pnand %p408_p3, %p402_p0 }
   0xb   :  { %412 = shalt.err (!%p409_p4)
}
   0xc   :  { %s481_s29 = smov 128   ;;  %s482_s30 = smov 8  }
   0xd   :  { %38 = dma.hbm_to_vmem [thread:$0]  %s569_s1, 512, %s33_s25, [#allocation7], %s481_s29, %s481_s29, %s482_s30  }
   0xe   :  { %s421_s10 = scalar_lea.vmem %s21_s27, 256  ;;  %p426_p6 = scmp.lt.s32.totalorder %s21_s27, %s21_s27 }
   0xf   :  { %p422_p5 = scmp.ne.s32.totalorder %s21_s27, %s421_s10  ;;  %p427_p7 = scmp.lt.s32.totalorder %s421_s10, %s421_s10 }
  0x11   :  { %p428_p8 = por %p427_p7, %p426_p6 }
  0x13   :  { %p429_p9 = pnand %p428_p8, %p422_p5 }
  0x15   :  { %432 = shalt.err (!%p429_p9)
}
  0x16   :  { %26 = dma.hbm_to_vmem [thread:$0]  %s568_s0, 256, %s21_s27, [#allocation4], %s481_s29, %s481_s29, %s482_s30  }
  0x17   :  { %s483_s13 = smov [#allocation8]  }
  0x18   :  { %s50_s14 = sshll.u32 %s483_s13, 4  ;;  %s51_s14 = int_to_ptr.vmem [resolvable:$true] %s50_s14 }
  0x19   :  { %s441_s15 = scalar_lea.vmem %s51_s14, 1024  ;;  %p446_p11 = scmp.lt.s32.totalorder %s51_s14, %s51_s14 }
  0x1a   :  { %p442_p10 = scmp.ne.s32.totalorder %s51_s14, %s441_s15  ;;  %p447_p12 = scmp.lt.s32.totalorder %s441_s15, %s441_s15 }
  0x1c   :  { %p448_p13 = por %p447_p12, %p446_p11 }
  0x1e   :  { %p449_p0 = pnand %p448_p13, %p442_p10 }
  0x20   :  { %452 = shalt.err (!%p449_p0)
}
  0x21   :  { %s484_s1 = smov 256   ;;  %s485_s16 = smov 16  }
  0x22   :  { %56 = dma.hbm_to_vmem [thread:$0]  %s573_s5, 1024, %s51_s14, [#allocation7], %s484_s1, %s484_s1, %s485_s16  }
  0x23   :  { %473 = dma.done.wait [#allocation4], 256  }
  0x24   :  { %474 = vsyncadd [#allocation4], 4294967040 }
  0x25   :  { %475 = dma.done.wait [#allocation7], 1536  }
  0x26   :  { %476 = vsyncadd [#allocation7], 4294965760  ;;  %vm87_vm0 = vcmask 261120   ;;  %v77_v0 = vld [vmem:[#allocation6 + $0x18] sm:$0xff]  ;;  %v76_v1 = vld [vmem:[#allocation6 + $0x10] sm:$0xff]  ;;  %v486_v41 = vmov 0.0   ;;  %v236_v60 = vlaneseq }
  0x27   :  { %365 = vmatprep.subr.mxu0 %v77_v0  ;;  %v72_v2 = vld [vmem:[#allocation3] sm:$0xff]  ;;  %v75_v3 = vld [vmem:[#allocation6 + $0x8] sm:$0xff]  ;;  %v74_v4 = vld [vmem:[#allocation6] sm:$0xff]  ;;  %317 = vmatprep.mubr.f32.mxu1 %v486_v41  ;;  %s487_s22 = smov [#allocation9]  }
  0x28   :  { %366 = vmatpush3.msra.mxu0 %v77_v0  ;;  %373 = vmatprep.mubr.msk.f32.mxu0 %vm87_vm0, %v72_v2  ;;  %v73_v5 = vld [vmem:[#allocation3 + $0x8] sm:$0xff]  ;;  %v352_v6 = vld [vmem:[%s570_s2] ss:$0 sm:$0xff]  ;;  %v232_v34 = vld [vmem:[#allocation8 + $0x30] sm:$0xff]  ;;  %v237_v61 = vshrl.u32 %v236_v60, 7  ;;  %s339_s23 = sshll.u32 %s487_s22, 4  ;;  %s340_s23 = int_to_ptr.vmem [resolvable:$true] %s339_s23 }
  0x29   :  { %367 = vmatprep.subr.mxu0 %v76_v1  ;;  %v233_v33 = vld [vmem:[#allocation8 + $0x38] sm:$0xff]  ;;  %v231_v35 = vld [vmem:[#allocation8 + $0x28] sm:$0xff]  ;;  %v230_v36 = vld [vmem:[#allocation8 + $0x20] sm:$0xff]  ;;  %s453_s24 = scalar_lea.vmem %s340_s23, 512  ;;  %p458_p2 = scmp.lt.s32.totalorder %s340_s23, %s340_s23 }
  0x2a   :  { %368 = vmatpush3.msra.mxu0 %v76_v1  ;;  %277 = vmatprep.subr.mxu1 %v233_v33  ;;  %v229_v37 = vld [vmem:[#allocation8 + $0x18] sm:$0xff]  ;;  %v228_v38 = vld [vmem:[#allocation8 + $0x10] sm:$0xff]  ;;  %v227_v39 = vld [vmem:[#allocation8 + $0x8] sm:$0xff]  ;;  %v238_v62 = vsub.s32 0, %v237_v61  ;;  %v242_v0 = vsub.s32 1, %v237_v61  ;;  %p454_p1 = scmp.ne.s32.totalorder %s340_s23, %s453_s24  ;;  %p459_p3 = scmp.lt.s32.totalorder %s453_s24, %s453_s24 }
  0x2b   :  { %369 = vmatprep.subr.mxu0 %v75_v3  ;;  %278 = vmatpush1.msra.mxu1 %v232_v34  ;;  %v226_v40 = vld [vmem:[#allocation8] sm:$0xff] }
  0x2c   :  { %370 = vmatpush3.msra.mxu0 %v75_v3  ;;  %279 = vmatprep.subr.mxu1 %v231_v35  ;;  %v355_v49 = vld [vmem:[%s571_s3] ss:$0 sm:$0xff]  ;;  %p460_p4 = por %p459_p3, %p458_p2 }
  0x2d   :  { %371 = vmatprep.subr.mxu0 %v74_v4  ;;  %280 = vmatpush1.msra.mxu1 %v230_v36  ;;  %v356_v51 = vld [vmem:[%s572_s4] ss:$0 sm:$0xff] }
  0x2e   :  { %372 = vmatpush3.msra.mxu0 %v74_v4  ;;  %281 = vmatprep.subr.mxu1 %v229_v37  ;;  %v234_v63 = vld [vmem:[%s574_s6] sm:$0x3]  ;;  %p461_p5 = pnand %p460_p4, %p454_p1 }
  0x2f   :  { %374 = vmatmul.mubr.msk.f32.vlgmr.msra.gmra.mxu0 %vm87_vm0, %v73_v5  ;;  %282 = vmatpush1.msra.mxu1 %v228_v38  ;;  %v239_v1 = vrot.slane %v234_v63, %v238_v62  ;;  %v243_v2 = vrot.slane %v234_v63, %v242_v0 }
  0x30   :  { %283 = vmatprep.subr.mxu1 %v227_v39 }
  0x31   :  { %284 = vmatpush1.msra.mxu1 %v226_v40 }
  0xef   :  { %v375_v7 = vpop.f32.mrf.mxu0 }
  0xf0   :  { %v166_v8 = vadd.f32 %v375_v7, %v352_v6 }
  0xf1   :  { %v160_v9 = vpop.f32.mrf.mxu0 }
  0xf2   :  { %v172_v10 = vmul.f32 0.70710677, %v166_v8  ;;  %v161_v11 = vadd.f32 %v352_v6, %v160_v9  ;;  %v170_v18 = vmul.f32 0.5, %v166_v8 }
  0xf4   :  { %385 = verf.f32 %v172_v10  ;;  %v171_v12 = vmul.f32 0.70710677, %v161_v11  ;;  %v169_v15 = vmul.f32 0.5, %v161_v11 }
  0xf6   :  { %387 = verf.f32 %v171_v12 }
 0x101   :  { %v386_v13 = vpop.eup %385 }
 0x102   :  { %v176_v17 = vadd.f32 1.0, %v386_v13 }
 0x103   :  { %v388_v14 = vpop.eup %387 }
 0x104   :  { %v175_v16 = vadd.f32 1.0, %v388_v14  ;;  %v178_v21 = vmul.f32 %v176_v17, %v170_v18 }
 0x106   :  { %v177_v19 = vmul.f32 %v175_v16, %v169_v15  ;;  %v182_v22 = vsel %vm87_vm0, %v178_v21, 0.0 }
 0x108   :  { %v179_v20 = vsel %vm87_vm0, %v177_v19, 0.0 }
 0x109   :  { %180 = vadd.xlane.f32.xlu0 %v179_v20 }
 0x10d   :  { %183 = vadd.xlane.f32.xlu0 %v182_v22 }
 0x192   :  { %v181_v23 = vpop.xlane.xlu0 %180 }
 0x193   :  { %v186_v24 = vmul.f32 0.03125, %v181_v23 }
 0x195   :  { %v188_v25 = vsub.f32 %v177_v19, %v186_v24 }
 0x196   :  { %v184_v26 = vpop.xlane.xlu0 %183 }
 0x197   :  { %v187_v27 = vmul.f32 0.03125, %v184_v26  ;;  %v190_v28 = vmul.f32 %v188_v25, %v188_v25 }
 0x199   :  { %v189_v29 = vsub.f32 %v178_v21, %v187_v27  ;;  %v192_v30 = vsel %vm87_vm0, %v190_v28, 0.0 }
 0x19a   :  { %193 = vadd.xlane.f32.xlu1 %v192_v30 }
 0x19b   :  { %v191_v31 = vmul.f32 %v189_v29, %v189_v29 }
 0x19d   :  { %v195_v32 = vsel %vm87_vm0, %v191_v31, 0.0 }
 0x19e   :  { %196 = vadd.xlane.f32.xlu1 %v195_v32 }
 0x223   :  { %v194_v42 = vpop.xlane.xlu1 %193 }
 0x224   :  { %v198_v43 = vmul.f32 0.03125, %v194_v42 }
 0x226   :  { %v200_v44 = vadd.f32 1e-05, %v198_v43 }
 0x227   :  { %v197_v45 = vpop.xlane.xlu1 %196 }
 0x228   :  { %389 = vrsqrt.f32 %v200_v44  ;;  %v199_v46 = vmul.f32 0.03125, %v197_v45 }
 0x22a   :  { %v201_v47 = vadd.f32 1e-05, %v199_v46 }
 0x22c   :  { %391 = vrsqrt.f32 %v201_v47 }
 0x235   :  { %v390_v48 = vpop.eup %389 }
 0x236   :  { %v204_v50 = vmul.f32 %v390_v48, %v188_v25 }
 0x238   :  { %v212_v52 = vmul.f32 %v355_v49, %v204_v50 }
 0x239   :  { %v392_v53 = vpop.eup %391 }
 0x23a   :  { %v220_v54 = vadd.f32 %v356_v51, %v212_v52  ;;  %v205_v55 = vmul.f32 %v392_v53, %v189_v29 }
 0x23c   :  { %222 = vst.msk [vmem:[#allocation2] sm:$0xff] %vm87_vm0, %v220_v54  ;;  %v213_v56 = vmul.f32 %v355_v49, %v205_v55 }
 0x23e   :  { %v221_v57 = vadd.f32 %v356_v51, %v213_v56 }
 0x240   :  { %223 = vst.msk [vmem:[#allocation2 + $0x8] sm:$0xff] %vm87_vm0, %v221_v57 }
 0x243   :  { %v224_v58 = vld [vmem:[#allocation2] sm:$0xff] }
 0x244   :  { %357 = vmatmul.mubr.msk.f32.vlgmr.msra.gmra.mxu1 %vm87_vm0, %v224_v58 }
 0x245   :  { %323 = vmatprep.mubr.f32.mxu1 %v486_v41 }
 0x247   :  { %v225_v59 = vld [vmem:[#allocation2 + $0x8] sm:$0xff] }
 0x248   :  { %358 = vmatmul.mubr.msk.f32.gmra.mxu1 %vm87_vm0, %v225_v59 }
 0x304   :  { %v319_v3 = vpop.f32.mrf.mxu1 }
 0x305   :  { %v320_v4 = vadd.f32 %v319_v3, %v239_v1 }
 0x306   :  { %v321_v5 = vpop.f32.mrf.mxu1 }
 0x307   :  { %330 = vst [vmem:[#allocation9] sm:$0xff] %v320_v4  ;;  %v322_v6 = vadd.f32 %v321_v5, %v243_v2 }
 0x308   :  { %v325_v7 = vpop.f32.mrf.mxu1 }
 0x309   :  { %331 = vst [vmem:[#allocation9 + $0x8] sm:$0xff] %v322_v6  ;;  %v326_v8 = vadd.f32 %v325_v7, %v239_v1 }
 0x30a   :  { %v327_v9 = vpop.f32.mrf.mxu1 }
 0x30b   :  { %332 = vst [vmem:[#allocation9 + $0x10] sm:$0xff] %v326_v8  ;;  %v328_v10 = vadd.f32 %v327_v9, %v243_v2 }
 0x30d   :  { %333 = vst [vmem:[#allocation9 + $0x18] sm:$0xff] %v328_v10 }
 0x30e   :  { %464 = shalt.err (!%p461_p5)
}
 0x30f   :  { %345 = dma.vmem_to_hbm [thread:$0]  %s340_s23, 512, %s575_s7, [#allocation5], %s484_s1, %s484_s1, %s485_s16  }
 0x310   :  { %477 = dma.done.wait [#allocation5], 512  }
 0x311   :  { %478 = vsyncadd [#allocation5], 4294966784 }
 0x312   :  { %349 = vsyncpa [#allocation4], 1 }
 0x313   :  { %350 = vsyncpa [#allocation7], 1 }
 0x314   :  { %351 = vsyncpa [#allocation5], 1 }

</bundles_post_ra>
